<compile_context>
chip_gen: v7x
topology: tpu7x:2x2x1
jax: 0.10.0
libtpu: 0.0.40
codegen_flags: <defaults>
</compile_context>

<pallas_src>
import functools

import jax
import jax.numpy as jnp
from jax import lax
from jax.experimental import pallas as pl
from jax.experimental.pallas import tpu as pltpu


def _layernorm_kernel(x_ref, g_ref, b_ref, o_ref, *, eps, features):
    # x_ref: (block_rows, F_pad); g_ref/b_ref: (1, F_pad) f32.
    f_pad = x_ref.shape[-1]
    x = x_ref[...].astype(jnp.float32)

    # Mean over the true feature count (padded lanes are zero, so the sum over
    # F_pad lanes equals the sum over the true F lanes).
    mean = jnp.sum(x, axis=-1, keepdims=True) * jnp.float32(1.0 / features)

    d = x - mean
    if f_pad != features:
        # Mask padded lanes out of the variance (they would contribute mean^2).
        lane = lax.broadcasted_iota(jnp.int32, d.shape, 1)
        d = jnp.where(lane < features, d, jnp.float32(0.0))

    # torch Tensor.std default: unbiased estimator (ddof=1); guard features==1.
    var = jnp.sum(d * d, axis=-1, keepdims=True) * jnp.float32(
        1.0 / max(features - 1, 1)
    )
    denom = jnp.sqrt(var) + jnp.float32(eps)            # (br, 1)

    # Narrow per-row reciprocal on the EUP slot + one Newton step (near-exact).
    inv = pl.reciprocal(denom, approx=True)
    inv = inv * (jnp.float32(2.0) - denom * inv)         # (br, 1)

    # Recompute (x - mean) from the VMEM-resident input tile for the output:
    # avoids keeping a full f32 diff tile live across the reduce/sqrt/recip
    # chain (extra vld pass is effectively free: 3 vld slots/cycle).
    xo = x_ref[...].astype(jnp.float32)
    o_ref[...] = (g_ref[...] * ((xo - mean) * inv) + b_ref[...]).astype(o_ref.dtype)


def _vmem_limit_bytes():
    """Scoped VMEM limit: half of physical VMEM, capped at 48 MiB."""
    try:
        cap = int(pltpu.get_tpu_info().vmem_capacity_bytes)
    except Exception:
        cap = 64 << 20  # conservative fallback (v7x per-TC physical VMEM)
    return min(cap // 2, 48 << 20)


def _choose_block_rows(rows, features_pad, in_itemsize, out_itemsize):
    """Row tile sized so the full per-step working set stays ~16 MiB."""
    # Per-step bytes per row: double-buffered input + output tiles plus ~2 live
    # f32 row-width intermediates (the f32 cast of x and one temp).
    per_row = (
        2 * features_pad * in_itemsize
        + 2 * features_pad * out_itemsize
        + 2 * features_pad * 4
    )
    budget = 16 << 20  # comfortably inside v7x's 64 MiB / the 48 MiB scoped limit
    br = max(budget // max(per_row, 1), 1)
    # Bandwidth saturates well before 1024 rows; bigger tiles only shrink the
    # grid (exposed prologue DMA, no core split) and raise VMEM pressure.
    br = min(br, 1024, rows)
    # Keep at least ~8 grid steps when the problem is big enough.
    br = min(br, max(pl.cdiv(rows, 8), 8))
    br = min(br, rows)
    # Align to the packed-dtype sublane tile: 8 (f32), 16 (bf16), 32 (int8/fp8).
    sub = max(8, 32 // max(int(in_itemsize), 1))
    if br >= sub:
        br = (br // sub) * sub
    return max(int(br), 1)


def layer_norm(x, a_2, b_2, eps=1e-6, block_rows=None):
    """x: (..., features); a_2, b_2: (features,). Same semantics as the spec module."""
    orig_shape = x.shape
    features = int(orig_shape[-1])
    rows = 1
    for d in orig_shape[:-1]:
        rows *= int(d)
    x2 = x.reshape(rows, features)

    # Lane-dense output: pad the feature dim to a multiple of 128 in the
    # wrapper (padded lanes are masked out of the stats in-kernel).
    f_pad = ((features + 127) // 128) * 128
    gamma = a_2.astype(jnp.float32).reshape(1, features)
    beta = b_2.astype(jnp.float32).reshape(1, features)
    if f_pad != features:
        pad = ((0, 0), (0, f_pad - features))
        x2 = jnp.pad(x2, pad)
        gamma = jnp.pad(gamma, pad)
        beta = jnp.pad(beta, pad)

    itemsize = jnp.dtype(x.dtype).itemsize
    if block_rows is None:
        block_rows = _choose_block_rows(rows, f_pad, itemsize, itemsize)
    block_rows = max(1, min(int(block_rows), rows))

    kernel = functools.partial(_layernorm_kernel, eps=float(eps), features=features)

    out = pl.pallas_call(
        kernel,
        out_shape=jax.ShapeDtypeStruct((rows, f_pad), x.dtype),
        grid_spec=pltpu.PrefetchScalarGridSpec(
            num_scalar_prefetch=0,
            grid=(pl.cdiv(rows, block_rows),),  # ragged trailing row block OK
            in_specs=[
                pl.BlockSpec((block_rows, f_pad), lambda i: (i, 0)),
                pl.BlockSpec((1, f_pad), lambda i: (0, 0)),   # gamma, resident
                pl.BlockSpec((1, f_pad), lambda i: (0, 0)),   # beta, resident
            ],
            out_specs=pl.BlockSpec((block_rows, f_pad), lambda i: (i, 0)),
        ),
        compiler_params=pltpu.CompilerParams(
            dimension_semantics=("parallel",),
            vmem_limit_bytes=_vmem_limit_bytes(),
        ),
    )(x2, gamma, beta)

    if f_pad != features:
        out = out[:, :features]
    return out.reshape(orig_shape)


if __name__ == "__main__":
    key = jax.random.PRNGKey(0)
    batch, seq, hidden = 2, 8, 32

    x = jax.random.normal(key, (batch, seq, hidden), dtype=jnp.float32)
    # Deterministic parameter init matching nn.Parameter(ones/zeros(features)).
    a_2 = jnp.ones((hidden,), dtype=jnp.float32)
    b_2 = jnp.zeros((hidden,), dtype=jnp.float32)

    out = layer_norm(x, a_2, b_2, eps=1e-6)
    out = jax.block_until_ready(out)

    # Reference (pure JAX, same semantics: unbiased std, eps added to std).
    mean = jnp.mean(x, axis=-1, keepdims=True)
    std = jnp.std(x, axis=-1, keepdims=True, ddof=1)
    ref = a_2 * (x - mean) / (std + 1e-6) + b_2
    assert jnp.allclose(out, ref, atol=1e-4, rtol=1e-4), "mismatch vs reference"

    print("KERNEL_OK")
</pallas_src>

<mosaic_0001>
module attributes {stable_mosaic.version = 11 : i64} {
  func.func @_layernorm_kernel(%arg0: i32, %arg1: memref<8x128xf32, #tpu.memory_space<vmem>>, %arg2: memref<1x128xf32, #tpu.memory_space<vmem>>, %arg3: memref<1x128xf32, #tpu.memory_space<vmem>>, %arg4: memref<8x128xf32, #tpu.memory_space<vmem>>) attributes {dimension_semantics = [#tpu.dimension_semantics<parallel>], iteration_bounds = array<i64: 2>, scalar_prefetch = 0 : i64, scratch_operands = 0 : i64, tpu.core_type = #tpu.core_type<tc>, window_params = [{transform_indices = @transform_0, window_bounds = array<i64: 8, 128>}, {pipeline_mode = #tpu.pipeline_mode<synchronous>, transform_indices = @transform_1, window_bounds = array<i64: 1, 128>}, {pipeline_mode = #tpu.pipeline_mode<synchronous>, transform_indices = @transform_2, window_bounds = array<i64: 1, 128>}, {transform_indices = @transform_3, window_bounds = array<i64: 8, 128>}]} {
    %c0 = arith.constant 0 : index
    %c0_0 = arith.constant 0 : index
    %0 = vector.load %arg1[%c0, %c0_0] : memref<8x128xf32, #tpu.memory_space<vmem>>, vector<8x128xf32>
    %cst = arith.constant dense<0.000000e+00> : vector<8xf32>
    %1 = vector.multi_reduction <add>, %0, %cst [1] : vector<8x128xf32> to vector<8xf32>
    %2 = vector.shape_cast %1 : vector<8xf32> to vector<8x1xf32>
    %cst_1 = arith.constant 3.125000e-02 : f32
    %3 = vector.broadcast %cst_1 : f32 to vector<8x1xf32>
    %4 = arith.mulf %2, %3 : vector<8x1xf32>
    %5 = vector.broadcast %4 : vector<8x1xf32> to vector<8x128xf32>
    %6 = arith.subf %0, %5 : vector<8x128xf32>
    %7 = tpu.iota {dimensions = array<i32: 1>} : vector<8x128xi32>
    %c32_i32 = arith.constant 32 : i32
    %8 = vector.broadcast %c32_i32 : i32 to vector<8x128xi32>
    %9 = arith.cmpi slt, %7, %8 : vector<8x128xi32>
    %cst_2 = arith.constant 0.000000e+00 : f32
    %10 = vector.broadcast %cst_2 : f32 to vector<8x128xf32>
    %11 = arith.select %9, %6, %10 : vector<8x128xi1>, vector<8x128xf32>
    %12 = arith.mulf %11, %11 : vector<8x128xf32>
    %cst_3 = arith.constant dense<0.000000e+00> : vector<8xf32>
    %13 = vector.multi_reduction <add>, %12, %cst_3 [1] : vector<8x128xf32> to vector<8xf32>
    %14 = vector.shape_cast %13 : vector<8xf32> to vector<8x1xf32>
    %cst_4 = arith.constant 0.0322580636 : f32
    %15 = vector.broadcast %cst_4 : f32 to vector<8x1xf32>
    %16 = arith.mulf %14, %15 : vector<8x1xf32>
    %17 = math.sqrt %16 : vector<8x1xf32>
    %cst_5 = arith.constant 9.99999997E-7 : f32
    %18 = vector.broadcast %cst_5 : f32 to vector<8x1xf32>
    %19 = arith.addf %17, %18 : vector<8x1xf32>
    %20 = tpu.reciprocal %19 {approx = true} : vector<8x1xf32> -> vector<8x1xf32>
    %21 = arith.mulf %19, %20 : vector<8x1xf32>
    %cst_6 = arith.constant 2.000000e+00 : f32
    %22 = vector.broadcast %cst_6 : f32 to vector<8x1xf32>
    %23 = arith.subf %22, %21 : vector<8x1xf32>
    %24 = arith.mulf %20, %23 : vector<8x1xf32>
    %c0_7 = arith.constant 0 : index
    %c0_8 = arith.constant 0 : index
    %25 = vector.load %arg1[%c0_7, %c0_8] : memref<8x128xf32, #tpu.memory_space<vmem>>, vector<8x128xf32>
    %c0_9 = arith.constant 0 : index
    %c0_10 = arith.constant 0 : index
    %26 = vector.load %arg2[%c0_9, %c0_10] : memref<1x128xf32, #tpu.memory_space<vmem>>, vector<1x128xf32>
    %27 = vector.broadcast %4 : vector<8x1xf32> to vector<8x128xf32>
    %28 = arith.subf %25, %27 : vector<8x128xf32>
    %29 = vector.broadcast %24 : vector<8x1xf32> to vector<8x128xf32>
    %30 = arith.mulf %28, %29 : vector<8x128xf32>
    %31 = vector.broadcast %26 : vector<1x128xf32> to vector<8x128xf32>
    %32 = arith.mulf %31, %30 : vector<8x128xf32>
    %c0_11 = arith.constant 0 : index
    %c0_12 = arith.constant 0 : index
    %33 = vector.load %arg3[%c0_11, %c0_12] : memref<1x128xf32, #tpu.memory_space<vmem>>, vector<1x128xf32>
    %34 = vector.broadcast %33 : vector<1x128xf32> to vector<8x128xf32>
    %35 = arith.addf %32, %34 : vector<8x128xf32>
    %c0_13 = arith.constant 0 : index
    %c0_14 = arith.constant 0 : index
    %36 = vector.load %arg4[%c0_13, %c0_14] : memref<8x128xf32, #tpu.memory_space<vmem>>, vector<8x128xf32>
    tpu.vector_store %arg4[%c0_13, %c0_14], %35 {strides = array<i32>} : memref<8x128xf32, #tpu.memory_space<vmem>>, vector<8x128xf32>,
    return
  }
  func.func @transform_0(%arg0: i32) -> (i32, i32) {
    %c0_i32 = arith.constant 0 : i32
    %c0_i32_0 = arith.constant 0 : i32
    return %arg0, %c0_i32 : i32, i32
  }
  func.func @transform_1(%arg0: i32) -> (i32, i32) {
    %c0_i32 = arith.constant 0 : i32
    %c0_i32_0 = arith.constant 0 : i32
    %c0_i32_1 = arith.constant 0 : i32
    return %c0_i32, %c0_i32_0 : i32, i32
  }
  func.func @transform_2(%arg0: i32) -> (i32, i32) {
    %c0_i32 = arith.constant 0 : i32
    %c0_i32_0 = arith.constant 0 : i32
    %c0_i32_1 = arith.constant 0 : i32
    return %c0_i32, %c0_i32_0 : i32, i32
  }
  func.func @transform_3(%arg0: i32) -> (i32, i32) {
    %c0_i32 = arith.constant 0 : i32
    %c0_i32_0 = arith.constant 0 : i32
    return %arg0, %c0_i32 : i32, i32
  }
}

</mosaic_0001>

<bundles_post_ra>
// kernel: tpu_custom_call.1
= control target key start
LH: loop header
LB: loop body
LE: loop exit
PB: predicated region body
PF: predicated region fallthrough
CT: control target
= control target key end

     0   :  { %8 = vsyncpa [#allocation3], 0  ;;  %s668_s0 = inlined_call_operand.hbm [shape: f32[16,128], index: 0, kind: input, shape index: {}]   ;;  %s669_s1 = inlined_call_operand.vmem [shape: f32[1,128], index: 1, kind: input, shape index: {}]   ;;  %s670_s2 = inlined_call_operand.vmem [shape: f32[1,128], index: 2, kind: input, shape index: {}]   ;;  %s671_s3 = inlined_call_operand.hbm [shape: f32[16,128], index: 3, kind: output, shape index: {}]  }
   0x1   :  { %10 = vsyncpa [#allocation3 + $0x1], 0 }
   0x2   :  { %11 = vsyncpa [#allocation4], 0 }
   0x3   :  { %13 = vsyncpa [#allocation4 + $0x1], 0  ;;  %s497_s12 = smov 0   ;;  %s499_s13 = smov 0  }
   0x4   :  { %s501_s14 = smov 0   ;;  %s503_s15 = smov 0  }
   0x5 LB: > { %s518_s16 = sadd.s32 4294967295, %s473_s15   ;;  %s313_s17 = sadd.s32 4294967294, %s473_s15   ;;  %s473_s15 = sphi %s503_s15, %s686_s15   ;;  %s469_s14 = sphi %s501_s14, %s685_s14   ;;  %s465_s13 = sphi %s499_s13, %s684_s13   ;;  %s461_s12 = sphi %s497_s12, %s683_s12  }
   0x6   : > { %s522_s18 = sadd.s32 1, %s473_s15   ;;  %s26_s19 = sadd.s32 1, %s469_s14 }
   0x7   : > { %s23_s20 = ssub.s32 %s473_s15, %s522_s18  ;;  %p33_p0 = scmp.ne.s32.totalorder %s469_s14, %s465_s13 }
   0x8   : > { %p24_p1 = scmp.eq.s32.totalorder %s23_s20, 0  ;;  %p34_p2 = scmp.eq.s32.totalorder %s473_s15, 0 }
   0x9   : > { %p39_p3 = scmp.ne.s32.totalorder %s465_s13, %s461_s12  ;;  %p40_p4 = scmp.eq.s32.totalorder %s518_s16, 0 }
   0xa   : > { %s534_s21 = scalar_select %p24_p1, %s469_s14, %s26_s19  }
   0xb   : > { %p536_p5 = por %p34_p2, %p33_p0  ;;  %p540_p6 = por %p40_p4, %p39_p3 }
   0xc   : > { %p105_p7 = scmp.eq.s32.totalorder %s518_s16, 1  ;;  %p111_p8 = scmp.eq.s32.totalorder %s313_s17, 1 }
   0xd   : > { %p339_p10 = scmp.lt.s32.totalorder %s473_s15, 2  ;;  %s137_s26 = sand.u32 1, %s469_s14  }
   0xe   : > { %p547_p11 = por %p105_p7, %p33_p0  ;;  %p551_p12 = por %p111_p8, %p39_p3 }
   0xf   : > { %s317_s27 = sshll.u32 %s473_s15, 7  ;;  %s316_s28 = sshll.u32 %s137_s26, 3 }
  0x10   : > { %s675_s24 = scalar_select %p547_p11, 1, 0 }
  0x11   : > { %s676_s25 = scalar_select %p551_p12, 1, 0 }
  0x12   : > { %s560_s4 = scalar_lea.hbm %s668_s0, %s317_s27  ;;  %s141_s5 = scalar_lea.vmem [#allocation2], %s316_s28 }
  0x13   : > { %s148_s6 = sshll.u32 %s141_s5, 4  ;;  %p564_p13 = pnand %p339_p10, %p536_p5  ;;  %s568_s6 = int_to_ptr.vmem [resolvable:$true] %s148_s6 }
  0x14   : > { %s138_s8 = scalar_lea.sflag [#allocation3], %s137_s26  ;;  %s377_s9 = scalar_lea.hbm %s560_s4, 128 }
  0x15   : > { %p378_p2 = scmp.ne.s32.totalorder %s560_s4, %s377_s9  ;;  %p379_p3 = pneg %p564_p13 }
  0x16   : > { %s382_s17 = scalar_lea.hbm %s668_s0, 256  ;;  %p383_p5 = scmp.lt.u32.totalorder %s560_s4, %s668_s0 }
  0x17   : > { %p380_p4 = pnand %p379_p3, %p378_p2  ;;  %p384_p8 = scmp.lt.u32.totalorder %s382_s17, %s377_s9 }
  0x18   : > { %p386_p9 = scmp.lt.u32.totalorder %s377_s9, %s560_s4 }
  0x19   : > { %p381_p7 = pneg %p380_p4  ;;  %p385_p10 = por %p384_p8, %p383_p5 }
  0x1b   : > { %p387_p0 = por %p386_p9, %p385_p10 }
  0x1d   : > { %p388_p1 = pnand %p387_p0, %p381_p7 }
  0x1f   : > { %391 = shalt.err (!%p388_p1)
}
  0x20   : > { %s392_s22 = scalar_lea.vmem %s568_s6, 128  ;;  %s475_s26 = smov [#allocation2]  }
  0x21   : > { %p393_p2 = scmp.ne.s32.totalorder %s568_s6, %s392_s22  ;;  %s397_s27 = sshll.u32 %s475_s26, 4  ;;  %s398_s27 = int_to_ptr.vmem [resolvable:$false] %s397_s27 }
  0x22   : > { %s399_s28 = scalar_lea.vmem %s398_s27, 256  ;;  %p400_p11 = scmp.lt.s32.totalorder %s568_s6, %s398_s27 }
  0x23   : > { %p395_p4 = pnand %p393_p2, %p379_p3  ;;  %p401_p5 = scmp.lt.s32.totalorder %s399_s28, %s392_s22 }
  0x25   : > { %p396_p12 = pneg %p395_p4  ;;  %p402_p8 = por %p401_p5, %p400_p11 }
  0x27   : > { %p403_p9 = pnand %p402_p8, %p396_p12 }
  0x29   : > { %406 = shalt.err (!%p403_p9)
}
  0x2a   : > { %334 = dma.hbm_to_vmem [thread:$0]  (!%p564_p13), %s560_s4, 128, %s568_s6, %s138_s8  }
  0x2b   : > { %p678_p0 = scmp.lt.s32.totalorder %s473_s15, 3  ;;  %p679_p1 = scmp.ge.s32.totalorder %s473_s15, 1 }
  0x2d   : > { %p154_p3 = pnand %p679_p1, %p678_p0 }
  0x2e   : > { %s602_s29 = sand.u32 (!%p154_p3), 1, %s465_s13  }
  0x2f   : > { %157 = sbr.rel (%p154_p3) target bundleno = 403 (0x193), region = 32  ;;  %s319_s30 = sshll.u32 (!%p154_p3), %s602_s29, 3 }
  0x30   : > { %s160_s5 = scalar_lea.sflag (!%p154_p3), [#allocation3], %s602_s29  ;;  %s163_s7 = scalar_lea.vmem (!%p154_p3), [#allocation2], %s319_s30 }
  0x36   : > { %452 = dma.done.wait (%p540_p6), %s160_s5, 128  }
  0x37   : > { %454 = vsyncadd (%p540_p6), %s160_s5, 4294967168  ;;  %v186_v0 = vld [vmem:[%s163_s7] sm:$0xff]  ;;  %v191_v1 = vlaneseq  ;;  %s324_s9 = sshll.u32 %s518_s16, 7  ;;  %s185_s10 = scalar_lea.vmem [#allocation5], %s319_s30 }
  0x38   : > { %187 = vadd.xlane.f32.xlu0 %v186_v0  ;;  %v321_v20 = vld [vmem:[%s669_s1] ss:$0 sm:$0xff]  ;;  %s243_s11 = sshll.u32 %s185_s10, 4  ;;  %s624_s20 = scalar_lea.hbm %s671_s3, %s324_s9  ;;  %s626_s11 = int_to_ptr.vmem [resolvable:$true] %s243_s11 }
  0x39   : > { %v192_v2 = vand.u32 127, %v191_v1  ;;  %v322_v22 = vld [vmem:[%s670_s2] ss:$0 sm:$0xff]  ;;  %s230_s22 = scalar_lea.sflag [#allocation4], %s602_s29  ;;  %s407_s26 = scalar_lea.vmem %s626_s11, 128 }
  0x3a   : > { %p408_p6 = scmp.ne.s32.totalorder %s626_s11, %s407_s26  ;;  %p680_p11 = scmp.ne.s32.totalorder %s675_s24, 0 }
  0x3b   : > { %vm193_vm0 = vcmp.lt.s32.totalorder %v192_v2, 32  ;;  %s476_s16 = smov [#allocation5]  }
  0x3c   : > { %p409_p12 = pnand %p408_p6, %p680_p11  ;;  %s411_s27 = sshll.u32 %s476_s16, 4  ;;  %s412_s27 = int_to_ptr.vmem [resolvable:$false] %s411_s27 }
  0x3d   : > { %s413_s28 = scalar_lea.vmem %s412_s27, 256  ;;  %p414_p7 = scmp.lt.s32.totalorder %s626_s11, %s412_s27 }
  0x3e   : > { %p410_p13 = pneg %p409_p12  ;;  %p415_p10 = scmp.lt.s32.totalorder %s413_s28, %s407_s26 }
  0x40   : > { %p416_p2 = por %p415_p10, %p414_p7 }
  0x42   : > { %p417_p4 = pnand %p416_p2, %p410_p13 }
  0xc5   : > { %v188_v3 = vpop.xlane.xlu0 %187 }
  0xc6   : > { %v189_v4 = vmul.f32 0.03125, %v188_v3 }
  0xc8   : > { %v190_v5 = vsub.f32 %v186_v0, %v189_v4 }
  0xca   : > { %v194_v6 = vsel %vm193_vm0, %v190_v5, 0.0 }
  0xcb   : > { %v195_v7 = vmul.f32 %v194_v6, %v194_v6 }
  0xcd   : > { %196 = vadd.xlane.f32.xlu0 %v195_v7 }
 0x15a   : > { %v197_v8 = vpop.xlane.xlu0 %196 }
 0x15b   : > { %v198_v9 = vmul.f32 0.032258064, %v197_v8 }
 0x15d   : > { %373 = vrsqrt.f32 %v198_v9  ;;  %vm201_vm1 = vcmp.eq.f32.partialorder %v198_v9, inf  ;;  %v204_v12 = vand.u32 2147483648, %v198_v9  ;;  %vm203_vm2 = vcmp.eq.f32.partialorder %v198_v9, 0.0 }
 0x167   : > { %v374_v10 = vpop.eup %373 }
 0x168   : > { %v200_v11 = vmul.f32 %v374_v10, %v198_v9 }
 0x16a   : > { %v202_v13 = vsel %vm201_vm1, %v198_v9, %v200_v11 }
 0x16b   : > { %v205_v14 = vsel %vm203_vm2, %v204_v12, %v202_v13 }
 0x16c   : > { %v206_v15 = vadd.f32 1e-06, %v205_v14 }
 0x16e   : > { %375 = vrcp.f32 %v206_v15 }
 0x178   : > { %v376_v16 = vpop.eup %375 }
 0x179   : > { %v208_v17 = vmul.f32 %v376_v16, %v206_v15 }
 0x17b   : > { %v209_v18 = vsub.f32 2.0, %v208_v17 }
 0x17d   : > { %v210_v19 = vmul.f32 %v376_v16, %v209_v18 }
 0x17f   : > { %v212_v21 = vmul.f32 %v210_v19, %v190_v5 }
 0x181   : > { %v219_v23 = vmul.f32 %v321_v20, %v212_v21 }
 0x183   : > { %v227_v24 = vadd.f32 %v322_v22, %v219_v23 }
 0x185   : > { %228 = vst [vmem:[%s185_s10] sm:$0xff] %v227_v24 }
 0x186   : > { %420 = shalt.err (!%p417_p4)
}
 0x187   : > { %s421_s29 = scalar_lea.hbm %s624_s20, 128  ;;  %s425_s7 = scalar_lea.hbm %s671_s3, 256 }
 0x188   : > { %p422_p5 = scmp.ne.s32.totalorder %s624_s20, %s421_s29  ;;  %p426_p0 = scmp.lt.u32.totalorder %s624_s20, %s671_s3 }
 0x189   : > { %p427_p1 = scmp.lt.u32.totalorder %s425_s7, %s421_s29  ;;  %p429_p6 = scmp.lt.u32.totalorder %s421_s29, %s624_s20 }
 0x18a   : > { %p423_p8 = pnand %p422_p5, %p680_p11 }
 0x18b   : > { %p428_p3 = por %p427_p1, %p426_p0 }
 0x18c   : > { %p424_p9 = pneg %p423_p8 }
 0x18d   : > { %p430_p12 = por %p429_p6, %p428_p3 }
 0x18f   : > { %p431_p13 = pnand %p430_p12, %p424_p9 }
 0x191   : > { %434 = shalt.err (!%p431_p13)
}
 0x192   : > { %329 = dma.vmem_to_hbm [thread:$0]  (%p680_p11), %s626_s11, 128, %s624_s20, %s230_s22  }
 0x193 PF: > { %s255_s6 = sand.u32 1, %s461_s12   ;;  %p681_p7 = scmp.ne.s32.totalorder %s676_s25, 0 }
 0x194   : > { %p682_p10 = scmp.ge.s32.totalorder %s473_s15, 2  ;;  %s256_s8 = scalar_lea.sflag [#allocation4], %s255_s6 }
 0x196   : > { %p336_p2 = pnand %p682_p10, %p681_p7 }
 0x198   : > { %456 = dma.done.wait (!%p336_p2), %s256_s8, 128  }
 0x199   : > { %458 = vsyncadd (!%p336_p2), %s256_s8, 4294967168  ;;  %p16_p4 = scmp.ge.s32.totalorder %s522_s18, 4   ;;  %s683_s12 = smov %s465_s13 }
 0x19a   : > { %s684_s13 = smov %s469_s14  ;;  %s685_s14 = smov %s534_s21 }
 0x19b   : > { %s686_s15 = smov %s522_s18  ;;  %18 = sbr.rel (!%p16_p4) target bundleno = 5 (0x5), region = 77 }
 0x1a2   :  { %261 = vsyncpa [#allocation3], 1 }
 0x1a3   :  { %263 = vsyncpa [#allocation3 + $0x1], 1 }
 0x1a4   :  { %264 = vsyncpa [#allocation4], 1 }
 0x1a5   :  { %266 = vsyncpa [#allocation4 + $0x1], 1 }

</bundles_post_ra>
